<compile_context>
chip_gen: v6e
topology: v6e:2x2x1
jax: 0.10.0
libtpu: 0.0.40
codegen_flags: <defaults>
</compile_context>

<pallas_src>
import numpy as np
import jax
import jax.numpy as jnp
from jax.experimental import pallas as pl
from jax.experimental.pallas import tpu as pltpu


def get_frequency_modes(seq_len, modes=64, mode_select_method='random'):
    """Same semantics as the PyTorch helper (np.random is seeded in __main__)."""
    modes = min(modes, seq_len // 2)
    if mode_select_method == 'random':
        index = list(range(0, seq_len // 2))
        np.random.shuffle(index)
        index = index[:modes]
    else:
        index = list(range(0, modes))
    index.sort()
    return index


def _round_up(x, n):
    return (x + n - 1) // n * n


def _choose_batch_tile(B, E_pad, O_pad, M, L, budget_bytes=12 * 1024 * 1024):
    """Largest divisor of B whose per-step f32 footprint fits the VMEM budget."""
    per_b = 4 * (2 * E_pad * L          # x block (double buffered)
                 + 2 * O_pad * L        # out block (double buffered)
                 + 2 * E_pad * M        # xf value
                 + 4 * E_pad * O_pad * M  # channel-mix temporaries
                 + 2 * O_pad * M        # out_re / out_im
                 + O_pad * L)           # y value
    bt = max(1, min(B, budget_bytes // max(per_b, 1)))
    while B % bt:
        bt -= 1
    return bt


def _make_kernel(Bt, E_pad, O_pad, M):
    def kernel(x_ref, f_ref, cr_ref, ci_ref, wr_ref, wi_ref, o_ref):
        # x_ref : (Bt*E_pad, L)   f_ref : (L, 2M)   cr/ci : (M, L)
        # wr/wi : (E_pad, O_pad, M)                 o_ref : (Bt*O_pad, L)

        # (1) mode-restricted rfft: ONE MXU pass, [Re | Im] stacked in lanes.
        xf = jnp.dot(x_ref[...], f_ref[...],
                     preferred_element_type=jnp.float32)        # (Bt*E_pad, 2M)
        xf = xf.reshape(Bt, E_pad, 2 * M)       # layout no-op: E_pad % 8 == 0
        xf_re = xf[:, :, :M]                    # (Bt, E_pad, M)
        xf_im = xf[:, :, M:]

        # (2) complex channel mix, contraction over E (vectorized, VPU).
        wr = wr_ref[...]                        # (E_pad, O_pad, M)
        wi = wi_ref[...]
        out_re = jnp.sum(xf_re[:, :, None, :] * wr[None]
                         - xf_im[:, :, None, :] * wi[None], axis=1)  # (Bt, O_pad, M)
        out_im = jnp.sum(xf_re[:, :, None, :] * wi[None]
                         + xf_im[:, :, None, :] * wr[None], axis=1)  # (Bt, O_pad, M)

        # (3) irfft of the M-slot spectrum: MXU, rows = Bt*O_pad.
        out_re = out_re.reshape(Bt * O_pad, M)  # layout no-op: O_pad % 8 == 0
        out_im = out_im.reshape(Bt * O_pad, M)
        y = (jnp.dot(out_re, cr_ref[...], preferred_element_type=jnp.float32)
             + jnp.dot(out_im, ci_ref[...], preferred_element_type=jnp.float32))
        o_ref[...] = y                          # (Bt*O_pad, L)
    return kernel


def fourier_block_forward(q, w_re, w_im, index):
    """q: (B, L, H, E) float32; w_re/w_im: (H, E, O, M). Returns ((B, H, O, L), None)."""
    B, L, H, E = q.shape
    Hw, Ew, O, M = w_re.shape
    assert Hw == H and Ew == E and M == len(index)

    E_pad = _round_up(E, 8)
    O_pad = _round_up(O, 8)

    # (H, B, E, L), zero-pad E, flatten rows b-major / e-minor -> (H, B*E_pad, L).
    # (Host transpose kept: with small E the gathered (L, E) slices of the raw
    #  layout would give poor DMA efficiency inside the kernel.)
    x = jnp.transpose(q, (2, 0, 3, 1)).astype(jnp.float32)
    if E_pad != E:
        x = jnp.pad(x, ((0, 0), (0, 0), (0, E_pad - E), (0, 0)))
    x2d = x.reshape(H, B * E_pad, L)

    wr = w_re.astype(jnp.float32)
    wi = w_im.astype(jnp.float32)
    if E_pad != E or O_pad != O:
        pad = ((0, 0), (0, E_pad - E), (0, O_pad - O), (0, 0))
        wr = jnp.pad(wr, pad)
        wi = jnp.pad(wi, pad)

    # Forward real DFT restricted to the selected modes: F = [cos | -sin], (L, 2M).
    l = np.arange(L, dtype=np.float64)[:, None]
    k_sel = np.asarray(index, dtype=np.float64)[None, :]
    ang = 2.0 * np.pi * l * k_sel / L
    F = np.concatenate([np.cos(ang), -np.sin(ang)], axis=1).astype(np.float32)

    # Inverse rfft for spectrum slots 0..M-1 (the module writes mode wi of the
    # result to slot wi, not index[wi]).  Note: the k == L//2 (Nyquist) branch
    # of `coef` is dead code because get_frequency_modes caps modes at L//2,
    # so slots run 0..M-1 <= L//2 - 1; kept for clarity.
    k_out = np.arange(M, dtype=np.float64)[:, None]
    j = np.arange(L, dtype=np.float64)[None, :]
    ang2 = 2.0 * np.pi * k_out * j / L
    coef = np.where((k_out == 0) | (k_out == L // 2), 1.0, 2.0) / L
    cr = (coef * np.cos(ang2)).astype(np.float32)    # (M, L)
    ci = (-coef * np.sin(ang2)).astype(np.float32)   # (M, L)

    F, cr, ci = jnp.asarray(F), jnp.asarray(cr), jnp.asarray(ci)

    Bt = _choose_batch_tile(B, E_pad, O_pad, M, L)
    grid = (H, B // Bt)                         # H outermost: weights stay resident
    kernel = _make_kernel(Bt, E_pad, O_pad, M)

    out2d = pl.pallas_call(
        kernel,
        out_shape=jax.ShapeDtypeStruct((H, B * O_pad, L), jnp.float32),
        grid=grid,
        in_specs=[
            pl.BlockSpec((None, Bt * E_pad, L), lambda h, b: (h, b, 0)),        # x rows
            pl.BlockSpec((L, 2 * M), lambda h, b: (0, 0)),                      # F (const)
            pl.BlockSpec((M, L), lambda h, b: (0, 0)),                          # cr (const)
            pl.BlockSpec((M, L), lambda h, b: (0, 0)),                          # ci (const)
            pl.BlockSpec((None, E_pad, O_pad, M), lambda h, b: (h, 0, 0, 0)),   # w_re (per head)
            pl.BlockSpec((None, E_pad, O_pad, M), lambda h, b: (h, 0, 0, 0)),   # w_im (per head)
        ],
        out_specs=pl.BlockSpec((None, Bt * O_pad, L), lambda h, b: (h, b, 0)),
        compiler_params=pltpu.CompilerParams(
            dimension_semantics=("parallel", "arbitrary"),
            vmem_limit_bytes=48 * 1024 * 1024),
    )(x2d, F, cr, ci, wr, wi)

    out = out2d.reshape(H, B, O_pad, L)[:, :, :O, :]   # drop padded output channels
    out = jnp.transpose(out, (1, 0, 2, 3))             # (B, H, O, L)
    return out, None


def reference_forward_numpy(q, w_re, w_im, index):
    """Pure numpy float64 replica of the PyTorch forward (uses real FFTs)."""
    q = np.asarray(q, dtype=np.float64)
    w = np.asarray(w_re, dtype=np.float64) + 1j * np.asarray(w_im, dtype=np.float64)
    B, L, H, E = q.shape
    O = w.shape[2]
    x = np.transpose(q, (0, 2, 3, 1))                    # (B, H, E, L)
    x_ft = np.fft.rfft(x, axis=-1)                       # (B, H, E, L//2+1)
    out_ft = np.zeros((B, H, O, L // 2 + 1), dtype=np.complex128)
    for slot, i in enumerate(index):
        out_ft[:, :, :, slot] = np.einsum('bhe,heo->bho', x_ft[:, :, :, i], w[:, :, :, slot])
    return np.fft.irfft(out_ft, n=L, axis=-1)            # (B, H, O, L)


if __name__ == "__main__":
    # Small shapes consistent with the module: q is (B, L, H, E), H must be 8.
    B, L, H = 2, 16, 8
    in_channels = out_channels = 32
    E = in_channels // 8
    O = out_channels // 8
    modes = 4

    np.random.seed(0)  # deterministic 'random' mode selection
    index = get_frequency_modes(L, modes=modes, mode_select_method='random')
    M = len(index)

    key = jax.random.PRNGKey(0)
    kq, kr, ki = jax.random.split(key, 3)
    q = jax.random.normal(kq, (B, L, H, E), dtype=jnp.float32)
    scale = 1.0 / (in_channels * out_channels)
    # torch.rand(..., dtype=cfloat): real and imag parts uniform in [0, 1).
    w_re = scale * jax.random.uniform(kr, (8, E, O, M), dtype=jnp.float32)
    w_im = scale * jax.random.uniform(ki, (8, E, O, M), dtype=jnp.float32)

    out, _ = fourier_block_forward(q, w_re, w_im, index)
    out = jax.block_until_ready(out)

    ref = reference_forward_numpy(np.asarray(q), np.asarray(w_re), np.asarray(w_im), index)
    np.testing.assert_allclose(np.asarray(out), ref, rtol=1e-3, atol=1e-4)
    print("KERNEL_OK")
</pallas_src>

<mosaic_0001>
module attributes {stable_mosaic.version = 11 : i64} {
  func.func @kernel(%arg0: i32, %arg1: i32, %arg2: memref<1x16x16xf32, #tpu.memory_space<vmem>>, %arg3: memref<16x8xf32, #tpu.memory_space<vmem>>, %arg4: memref<4x16xf32, #tpu.memory_space<vmem>>, %arg5: memref<4x16xf32, #tpu.memory_space<vmem>>, %arg6: memref<1x8x8x4xf32, #tpu.memory_space<vmem>>, %arg7: memref<1x8x8x4xf32, #tpu.memory_space<vmem>>, %arg8: memref<1x16x16xf32, #tpu.memory_space<vmem>>) attributes {dimension_semantics = [#tpu.dimension_semantics<parallel>, #tpu.dimension_semantics<arbitrary>], iteration_bounds = array<i64: 8, 1>, scalar_prefetch = 0 : i64, scratch_operands = 0 : i64, tpu.core_type = #tpu.core_type<tc>, window_params = [{transform_indices = @transform_0, window_bounds = array<i64: 1, 16, 16>}, {pipeline_mode = #tpu.pipeline_mode<synchronous>, transform_indices = @transform_1, window_bounds = array<i64: 16, 8>}, {pipeline_mode = #tpu.pipeline_mode<synchronous>, transform_indices = @transform_2, window_bounds = array<i64: 4, 16>}, {pipeline_mode = #tpu.pipeline_mode<synchronous>, transform_indices = @transform_3, window_bounds = array<i64: 4, 16>}, {transform_indices = @transform_4, window_bounds = array<i64: 1, 8, 8, 4>}, {transform_indices = @transform_5, window_bounds = array<i64: 1, 8, 8, 4>}, {transform_indices = @transform_6, window_bounds = array<i64: 1, 16, 16>}]} {
    %c0 = arith.constant 0 : index
    %c0_0 = arith.constant 0 : index
    %c0_1 = arith.constant 0 : index
    %0 = vector.load %arg2[%c0, %c0_0, %c0_1] : memref<1x16x16xf32, #tpu.memory_space<vmem>>, vector<1x16x16xf32>
    %1 = vector.shape_cast %0 : vector<1x16x16xf32> to vector<16x16xf32>
    %c0_2 = arith.constant 0 : index
    %c0_3 = arith.constant 0 : index
    %2 = vector.load %arg3[%c0_2, %c0_3] : memref<16x8xf32, #tpu.memory_space<vmem>>, vector<16x8xf32>
    %cst = arith.constant dense<0.000000e+00> : vector<16x8xf32>
    %3 = tpu.matmul %1, %2, %cst {dimension_numbers = #tpu.dot_dimension_numbers<[1], [0], [0], [1], [0, 0, 1, 1], [], []>} : vector<16x16xf32>, vector<16x8xf32>, vector<16x8xf32> -> vector<16x8xf32>
    %4 = vector.shape_cast %3 : vector<16x8xf32> to vector<2x8x8xf32>
    %5 = vector.extract_strided_slice %4 {offsets = [0, 0, 0], sizes = [2, 8, 4], strides = [1, 1, 1]} : vector<2x8x8xf32> to vector<2x8x4xf32>
    %6 = vector.extract_strided_slice %4 {offsets = [0, 0, 4], sizes = [2, 8, 4], strides = [1, 1, 1]} : vector<2x8x8xf32> to vector<2x8x4xf32>
    %c0_4 = arith.constant 0 : index
    %c0_5 = arith.constant 0 : index
    %c0_6 = arith.constant 0 : index
    %c0_7 = arith.constant 0 : index
    %7 = vector.load %arg6[%c0_4, %c0_5, %c0_6, %c0_7] : memref<1x8x8x4xf32, #tpu.memory_space<vmem>>, vector<1x8x8x4xf32>
    %8 = vector.shape_cast %7 : vector<1x8x8x4xf32> to vector<8x8x4xf32>
    %c0_8 = arith.constant 0 : index
    %c0_9 = arith.constant 0 : index
    %c0_10 = arith.constant 0 : index
    %c0_11 = arith.constant 0 : index
    %9 = vector.load %arg7[%c0_8, %c0_9, %c0_10, %c0_11] : memref<1x8x8x4xf32, #tpu.memory_space<vmem>>, vector<1x8x8x4xf32>
    %10 = vector.shape_cast %9 : vector<1x8x8x4xf32> to vector<8x8x4xf32>
    %11 = vector.shape_cast %5 : vector<2x8x4xf32> to vector<2x8x1x4xf32>
    %12 = vector.shape_cast %8 : vector<8x8x4xf32> to vector<1x8x8x4xf32>
    %13 = vector.broadcast %11 : vector<2x8x1x4xf32> to vector<2x8x8x4xf32>
    %14 = vector.broadcast %12 : vector<1x8x8x4xf32> to vector<2x8x8x4xf32>
    %15 = arith.mulf %13, %14 : vector<2x8x8x4xf32>
    %16 = vector.shape_cast %6 : vector<2x8x4xf32> to vector<2x8x1x4xf32>
    %17 = vector.shape_cast %10 : vector<8x8x4xf32> to vector<1x8x8x4xf32>
    %18 = vector.broadcast %16 : vector<2x8x1x4xf32> to vector<2x8x8x4xf32>
    %19 = vector.broadcast %17 : vector<1x8x8x4xf32> to vector<2x8x8x4xf32>
    %20 = arith.mulf %18, %19 : vector<2x8x8x4xf32>
    %21 = arith.subf %15, %20 : vector<2x8x8x4xf32>
    %cst_12 = arith.constant dense<0.000000e+00> : vector<2x8x4xf32>
    %22 = vector.multi_reduction <add>, %21, %cst_12 [1] : vector<2x8x8x4xf32> to vector<2x8x4xf32>
    %23 = vector.shape_cast %5 : vector<2x8x4xf32> to vector<2x8x1x4xf32>
    %24 = vector.shape_cast %10 : vector<8x8x4xf32> to vector<1x8x8x4xf32>
    %25 = vector.broadcast %23 : vector<2x8x1x4xf32> to vector<2x8x8x4xf32>
    %26 = vector.broadcast %24 : vector<1x8x8x4xf32> to vector<2x8x8x4xf32>
    %27 = arith.mulf %25, %26 : vector<2x8x8x4xf32>
    %28 = vector.shape_cast %6 : vector<2x8x4xf32> to vector<2x8x1x4xf32>
    %29 = vector.shape_cast %8 : vector<8x8x4xf32> to vector<1x8x8x4xf32>
    %30 = vector.broadcast %28 : vector<2x8x1x4xf32> to vector<2x8x8x4xf32>
    %31 = vector.broadcast %29 : vector<1x8x8x4xf32> to vector<2x8x8x4xf32>
    %32 = arith.mulf %30, %31 : vector<2x8x8x4xf32>
    %33 = arith.addf %27, %32 : vector<2x8x8x4xf32>
    %cst_13 = arith.constant dense<0.000000e+00> : vector<2x8x4xf32>
    %34 = vector.multi_reduction <add>, %33, %cst_13 [1] : vector<2x8x8x4xf32> to vector<2x8x4xf32>
    %35 = vector.shape_cast %22 : vector<2x8x4xf32> to vector<16x4xf32>
    %36 = vector.shape_cast %34 : vector<2x8x4xf32> to vector<16x4xf32>
    %c0_14 = arith.constant 0 : index
    %c0_15 = arith.constant 0 : index
    %37 = vector.load %arg4[%c0_14, %c0_15] : memref<4x16xf32, #tpu.memory_space<vmem>>, vector<4x16xf32>
    %cst_16 = arith.constant dense<0.000000e+00> : vector<16x16xf32>
    %38 = tpu.matmul %35, %37, %cst_16 {dimension_numbers = #tpu.dot_dimension_numbers<[1], [0], [0], [1], [0, 0, 1, 1], [], []>} : vector<16x4xf32>, vector<4x16xf32>, vector<16x16xf32> -> vector<16x16xf32>
    %c0_17 = arith.constant 0 : index
    %c0_18 = arith.constant 0 : index
    %39 = vector.load %arg5[%c0_17, %c0_18] : memref<4x16xf32, #tpu.memory_space<vmem>>, vector<4x16xf32>
    %cst_19 = arith.constant dense<0.000000e+00> : vector<16x16xf32>
    %40 = tpu.matmul %36, %39, %cst_19 {dimension_numbers = #tpu.dot_dimension_numbers<[1], [0], [0], [1], [0, 0, 1, 1], [], []>} : vector<16x4xf32>, vector<4x16xf32>, vector<16x16xf32> -> vector<16x16xf32>
    %41 = arith.addf %38, %40 : vector<16x16xf32>
    %c0_20 = arith.constant 0 : index
    %c0_21 = arith.constant 0 : index
    %c0_22 = arith.constant 0 : index
    %42 = vector.load %arg8[%c0_20, %c0_21, %c0_22] : memref<1x16x16xf32, #tpu.memory_space<vmem>>, vector<1x16x16xf32>
    %43 = vector.shape_cast %42 : vector<1x16x16xf32> to vector<16x16xf32>
    %44 = vector.shape_cast %41 : vector<16x16xf32> to vector<1x16x16xf32>
    tpu.vector_store %arg8[%c0_20, %c0_21, %c0_22], %44 {strides = array<i32>} : memref<1x16x16xf32, #tpu.memory_space<vmem>>, vector<1x16x16xf32>,
    return
  }
  func.func @transform_0(%arg0: i32, %arg1: i32) -> (i32, i32, i32) {
    %c0_i32 = arith.constant 0 : i32
    %c0_i32_0 = arith.constant 0 : i32
    return %arg0, %arg1, %c0_i32 : i32, i32, i32
  }
  func.func @transform_1(%arg0: i32, %arg1: i32) -> (i32, i32) {
    %c0_i32 = arith.constant 0 : i32
    %c0_i32_0 = arith.constant 0 : i32
    %c0_i32_1 = arith.constant 0 : i32
    return %c0_i32, %c0_i32_0 : i32, i32
  }
  func.func @transform_2(%arg0: i32, %arg1: i32) -> (i32, i32) {
    %c0_i32 = arith.constant 0 : i32
    %c0_i32_0 = arith.constant 0 : i32
    %c0_i32_1 = arith.constant 0 : i32
    return %c0_i32, %c0_i32_0 : i32, i32
  }
  func.func @transform_3(%arg0: i32, %arg1: i32) -> (i32, i32) {
    %c0_i32 = arith.constant 0 : i32
    %c0_i32_0 = arith.constant 0 : i32
    %c0_i32_1 = arith.constant 0 : i32
    return %c0_i32, %c0_i32_0 : i32, i32
  }
  func.func @transform_4(%arg0: i32, %arg1: i32) -> (i32, i32, i32, i32) {
    %c0_i32 = arith.constant 0 : i32
    %c0_i32_0 = arith.constant 0 : i32
    %c0_i32_1 = arith.constant 0 : i32
    %c0_i32_2 = arith.constant 0 : i32
    return %arg0, %c0_i32, %c0_i32_0, %c0_i32_1 : i32, i32, i32, i32
  }
  func.func @transform_5(%arg0: i32, %arg1: i32) -> (i32, i32, i32, i32) {
    %c0_i32 = arith.constant 0 : i32
    %c0_i32_0 = arith.constant 0 : i32
    %c0_i32_1 = arith.constant 0 : i32
    %c0_i32_2 = arith.constant 0 : i32
    return %arg0, %c0_i32, %c0_i32_0, %c0_i32_1 : i32, i32, i32, i32
  }
  func.func @transform_6(%arg0: i32, %arg1: i32) -> (i32, i32, i32) {
    %c0_i32 = arith.constant 0 : i32
    %c0_i32_0 = arith.constant 0 : i32
    return %arg0, %arg1, %c0_i32 : i32, i32, i32
  }
}

</mosaic_0001>

<bundles_post_ra>
// kernel: tpu_custom_call.1
= control target key start
LH: loop header
LB: loop body
LE: loop exit
PB: predicated region body
PF: predicated region fallthrough
CT: control target
= control target key end

     0   :  { %11 = vsyncpa [#allocation3], 0  ;;  %s1943_s0 = inlined_call_operand.vmem [shape: f32[8,16,16], index: 0, kind: input, shape index: {}]   ;;  %s1944_s1 = inlined_call_operand.vmem [shape: f32[16,8], index: 1, kind: input, shape index: {}]   ;;  %s1945_s2 = inlined_call_operand.vmem [shape: f32[4,16], index: 2, kind: input, shape index: {}]   ;;  %s1946_s3 = inlined_call_operand.vmem [shape: f32[4,16], index: 3, kind: input, shape index: {}]   ;;  %s1947_s4 = inlined_call_operand.vmem [shape: f32[8,8,8,4], index: 4, kind: input, shape index: {}]   ;;  %s1948_s5 = inlined_call_operand.vmem [shape: f32[8,8,8,4], index: 5, kind: input, shape index: {}]   ;;  %s1949_s6 = inlined_call_operand.hbm [shape: f32[8,16,16], index: 6, kind: output, shape index: {}]  }
   0x1   :  { %13 = vsyncpa [#allocation3 + $0x1], 0  ;;  %s1479_s21 = smov 0   ;;  %s1481_s22 = smov 0  }
   0x2   :  { %s1483_s23 = smov 0   ;;  %s1485_s24 = smov 0  }
   0x3   :  { %s1487_s25 = smov 0   ;;  %s1489_s26 = smov 0  }
   0x4 LB: > { %s1244_s27 = sadd.s32 4294967295, %s1436_s26   ;;  %s1245_s28 = sadd.s32 4294967294, %s1436_s26   ;;  %s1436_s26 = sphi %s1489_s26, %s19_s26   ;;  %s1432_s25 = sphi %s1487_s25, %s1956_s25   ;;  %s1428_s24 = sphi %s1485_s24, %s1955_s24   ;;  %s1424_s23 = sphi %s1483_s23, %s1954_s23   ;;  %s1420_s22 = sphi %s1481_s22, %s1953_s22   ;;  %s1416_s21 = sphi %s1479_s21, %s1952_s21  }
   0x5   : > { %s31_s29 = sadd.s32 1, %s1432_s25  ;;  %s183_s30 = sadd.s32 1, %s1424_s23 }
   0x6   : > { %p33_p0 = scmp.ge.s32.totalorder %s31_s29, 8  ;;  %p193_p1 = scmp.ne.s32.totalorder %s1424_s23, %s1420_s22 }
   0x7   : > { %p194_p2 = scmp.eq.s32.totalorder %s1244_s27, 7  ;;  %p199_p3 = scmp.ne.s32.totalorder %s1420_s22, %s1416_s21 }
   0x8   : > { %s1958_s29 = smov (%p33_p0, %s31_s29), 0  ;;  %p200_p5 = scmp.eq.s32.totalorder %s1245_s28, 7 }
   0x9   : > { %p1519_p4 = por %p194_p2, %p193_p1  ;;  %s178_s8 = ssub.s32 %s1432_s25, %s1958_s29 }
   0xa   : > { %p1248_p6 = scmp.ge.s32.totalorder %s1436_s26, 1  ;;  %p181_p7 = scmp.eq.s32.totalorder %s178_s8, 0 }
   0xb   : > { %p1526_p8 = por %p200_p5, %p199_p3  ;;  %p256_p9 = scmp.lt.s32.totalorder %s1436_s26, 9 }
   0xc   : > { %s1532_s10 = scalar_select %p181_p7, %s1424_s23, %s183_s30  }
   0xd   : > { %p257_p10 = pnand %p1248_p6, %p256_p9 }
   0xe   : > { %p301_p11 = scmp.lt.s32.totalorder (!%p257_p10), %s1428_s24, 7  ;;  %s1438_s13 = smov (!%p257_p10), 4  }
   0xf   : > { %260 = sbr.rel (%p257_p10) target bundleno = 619 (0x26b), region = 44  ;;  %s1440_s14 = smov (!%p257_p10), 124  }
  0x10   : > { %s297_s19 = sand.u32 (!%p257_p10), 1, %s1420_s22  }
  0x14   : > { %v324_v0 = vld [vmem:[%s1944_s1 + $0x8] sm:$0xff]  ;;  %v323_v1 = vld [vmem:[%s1944_s1] sm:$0xff]  ;;  %s302_s15 = scalar_select %p301_p11, %s1428_s24, 7  ;;  %vm325_vm0 = vcmask 130048   ;;  %v1439_v20 = vmov 1966171168   ;;  %v429_v22 = vlaneseq }
  0x15   : > { %1283 = vmatprep.subr.mxu0 %v324_v0  ;;  %v427_v21 = vunpack.c.l.s4 %v1439_v20  ;;  %vm960_vm1 = vcmask 1043456   ;;  %vm747_vm2 = vcmask 31744  }
  0x16   : > { %1284 = vmatpush3.msra.mxu0 %v324_v0  ;;  %s1269_s16 = sshll.u32 %s302_s15, 4  ;;  %s1270_s17 = sshll.u32 %s302_s15, 6  ;;  %v430_v24 = vshrl.u32 %v429_v22, 7 }
  0x17   : > { %1285 = vmatprep.subr.mxu0 %v323_v1  ;;  %s308_s20 = scalar_lea.vmem %s1943_s0, %s1269_s16  ;;  %s1548_s30 = scalar_lea.vmem %s1947_s4, %s1270_s17  ;;  %v428_v23 = vunpack.c.0.s8 %v427_v21 }
  0x18   : > { %1286 = vmatpush3.msra.mxu0 %v323_v1  ;;  %s1553_s12 = scalar_lea.vmem %s1948_s5, %s1270_s17  ;;  %v321_v2 = vld [vmem:[%s308_s20] sm:$0xff]  ;;  %v322_v3 = vld [vmem:[%s308_s20 + $0x8] sm:$0xff]  ;;  %v1562_v5 = vld [vmem:[%s1548_s30 + $0x10] sm:$0xff]  ;;  %v1641_v31 = vsub.s32 0, %v430_v24  ;;  %s1249_s20 = sshll.u32 %s297_s19, 4 }
  0x19   : > { %v1556_v4 = vld [vmem:[%s1548_s30] sm:$0xff]  ;;  %1287 = vmatprep.mubr.msk.f32.mxu0 %vm325_vm0, %v321_v2  ;;  %806 = vrot.lane.b32.xlu1 %v1562_v5, %s1438_s13  ;;  %v1568_v6 = vld [vmem:[%s1548_s30 + $0x8] sm:$0xff]  ;;  %v1581_v9 = vld [vmem:[%s1548_s30 + $0x18] sm:$0xff]  ;;  %v1637_v25 = vsub.s32 %v428_v23, %v430_v24  ;;  %s299_s27 = scalar_lea.vmem [#allocation2], %s1249_s20 }
  0x1a   : > { %802 = vrot.lane.b32.xlu0 %v1556_v4, %s1438_s13  ;;  %1288 = vmatmul.mubr.msk.f32.vlgmr.msra.gmra.mxu0 %vm325_vm0, %v322_v3  ;;  %v1571_v7 = vld [vmem:[%s1553_s12] sm:$0xff]  ;;  %v1578_v8 = vld [vmem:[%s1553_s12 + $0x8] sm:$0xff]  ;;  %v1588_v10 = vld [vmem:[%s1553_s12 + $0x10] sm:$0xff]  ;;  %s1141_s28 = sshll.u32 %s299_s27, 4  ;;  %s1889_s28 = int_to_ptr.vmem [resolvable:$true] %s1141_s28 }
  0x1b   : > { %v1591_v11 = vld [vmem:[%s1548_s30 + $0x20] sm:$0xff]  ;;  %v1598_v12 = vld [vmem:[%s1553_s12 + $0x18] sm:$0xff]  ;;  %v1601_v13 = vld [vmem:[%s1548_s30 + $0x28] sm:$0xff] }
  0x1c   : > { %v1608_v14 = vld [vmem:[%s1553_s12 + $0x20] sm:$0xff]  ;;  %v1611_v15 = vld [vmem:[%s1548_s30 + $0x30] sm:$0xff]  ;;  %v1618_v16 = vld [vmem:[%s1553_s12 + $0x28] sm:$0xff] }
  0x1d   : > { %627 = vrot.lane.b32.xlu1 %v1571_v7, %s1438_s13  ;;  %v1621_v17 = vld [vmem:[%s1548_s30 + $0x38] sm:$0xff]  ;;  %v1628_v18 = vld [vmem:[%s1553_s12 + $0x30] sm:$0xff]  ;;  %s1272_s30 = sshll.u32 %s1428_s24, 8  ;;  %s1360_s24 = scalar_lea.vmem %s1889_s28, 256 }
  0x1e   : > { %804 = vrot.lane.b32.xlu0 %v1568_v6, %s1438_s13  ;;  %v1631_v19 = vld [vmem:[%s1553_s12 + $0x38] sm:$0xff]  ;;  %s1895_s12 = scalar_lea.hbm %s1949_s6, %s1272_s30  ;;  %p1361_p12 = scmp.ne.s32.totalorder %s1889_s28, %s1360_s24 }
  0x20   : > { %p1362_p13 = pnand %p1361_p12, %p1519_p4 }
  0x21   : > { %808 = vrot.lane.b32.xlu1 %v1581_v9, %s1438_s13 }
  0x22   : > { %629 = vrot.lane.b32.xlu0 %v1578_v8, %s1438_s13  ;;  %p1363_p0 = pneg %p1362_p13 }
  0x25   : > { %810 = vrot.lane.b32.xlu1 %v1591_v11, %s1438_s13 }
  0x26   : > { %631 = vrot.lane.b32.xlu0 %v1588_v10, %s1438_s13 }
  0x29   : > { %812 = vrot.lane.b32.xlu1 %v1601_v13, %s1438_s13 }
  0x2a   : > { %633 = vrot.lane.b32.xlu0 %v1598_v12, %s1438_s13 }
  0x2d   : > { %814 = vrot.lane.b32.xlu1 %v1611_v15, %s1438_s13 }
  0x2e   : > { %635 = vrot.lane.b32.xlu0 %v1608_v14, %s1438_s13 }
  0x31   : > { %816 = vrot.lane.b32.xlu1 %v1621_v17, %s1438_s13 }
  0x32   : > { %637 = vrot.lane.b32.xlu0 %v1618_v16, %s1438_s13 }
  0x35   : > { %641 = vrot.lane.b32.xlu1 %v1631_v19, %s1438_s13 }
  0x36   : > { %639 = vrot.lane.b32.xlu0 %v1628_v18, %s1438_s13  ;;  %s1898_s13 = scalar_lea.sflag [#allocation3], %s297_s19 }
  0x8b   : > { %v807_v34 = vpop.permute.xlu1 %806 }
  0x8c   : > { %v803_v28 = vpop.permute.xlu0 %802 }
  0x8f   : > { %v628_v42 = vpop.permute.xlu1 %627 }
  0x90   : > { %v805_v35 = vpop.permute.xlu0 %804 }
  0x93   : > { %v1667_v53 = vpop.permute.xlu1 %808 }
  0x94   : > { %v630_v43 = vpop.permute.xlu0 %629 }
  0x97   : > { %v811_v60 = vpop.permute.xlu1 %810 }
  0x98   : > { %v632_v54 = vpop.permute.xlu0 %631 }
  0x9c   : > { %v1679_v61 = vpop.permute.xlu0 %633 }
  0xa0   : > { %v636_v22 = vpop.permute.xlu0 %635 }
  0xda   : > { %v1289_v26 = vpop.f32.mrf.mxu0 }
  0xdb   : > { %v481_v27 = vrot.slane %v1289_v26, %v1637_v25  ;;  %v474_v38 = vcombine.high %v1289_v26, %v1289_v26 }
  0xdc   : > { %v398_v29 = vpop.f32.mrf.mxu0 }
  0xdd   : > { %v497_v30 = vrot.slane %v481_v27, %v1637_v25  ;;  %v432_v32 = vrot.slane %v398_v29, %v1637_v25  ;;  %v489_v33 = vcombine.high %v481_v27, %v481_v27  ;;  %v488_v44 = vrot.slane %v474_v38, %v1637_v25 }
  0xde   : > { %v425_v62 = vcombine.high %v398_v29, %v398_v29 }
  0xdf   : > { %v1645_v36 = vrot.slane %v497_v30, %v1641_v31  ;;  %v448_v37 = vrot.slane %v432_v32, %v1637_v25  ;;  %v511_v39 = vrot.slane %v489_v33, %v1637_v25  ;;  %v519_v45 = vcombine.high %v497_v30, %v497_v30 }
  0xe0   : > { %v504_v49 = vrot.slane %v488_v44, %v1637_v25  ;;  %v440_v51 = vcombine.high %v432_v32, %v432_v32  ;;  %v439_v20 = vrot.slane %v425_v62, %v1637_v25  ;;  %v490_v26 = vcombine.high %v488_v44, %v488_v44 }
  0xe1   : > { %v1650_v40 = vrot.slane %v448_v37, %v1641_v31  ;;  %v834_v41 = vmul.f32 %v803_v28, %v1645_v36  ;;  %v1655_v46 = vrot.slane %v511_v39, %v1641_v31  ;;  %v659_v47 = vmul.f32 %v628_v42, %v1645_v36 }
  0xe2   : > { %v1663_v50 = vrot.slane %v519_v45, %v1641_v31  ;;  %v1672_v56 = vrot.slane %v504_v49, %v1641_v31  ;;  %v462_v57 = vrot.slane %v440_v51, %v1637_v25  ;;  %v470_v1 = vcombine.high %v448_v37, %v448_v37 }
  0xe3   : > { %874 = vrot.lane.b32.xlu0 %v834_v41, %s1440_s14  ;;  %699 = vrot.lane.b32.xlu1 %v659_v47, %s1440_s14  ;;  %v826_v48 = vmul.f32 %v803_v28, %v1650_v40  ;;  %v835_v52 = vmul.f32 %v805_v35, %v1655_v46  ;;  %v651_v55 = vmul.f32 %v628_v42, %v1650_v40  ;;  %v813_v42 = vpop.permute.xlu1 %812 }
  0xe4   : > { %v836_v58 = vmul.f32 %v807_v34, %v1663_v50  ;;  %v660_v59 = vmul.f32 %v630_v43, %v1655_v46  ;;  %v1682_v63 = vrot.slane %v462_v57, %v1641_v31  ;;  %v838_v0 = vmul.f32 %v811_v60, %v1672_v56 }
  0xe5   : > { %v661_v2 = vmul.f32 %v632_v54, %v1663_v50  ;;  %v521_v3 = vcombine.high %v511_v39, %v511_v39  ;;  %v663_v23 = vmul.f32 %v636_v22, %v1672_v56  ;;  %v1693_v24 = vrot.slane %v470_v1, %v1641_v31 }
  0xe6   : > { %v827_v21 = vmul.f32 %v805_v35, %v1682_v63  ;;  %v455_v28 = vrot.slane %v439_v20, %v1637_v25  ;;  %v652_v29 = vmul.f32 %v630_v43, %v1682_v63  ;;  %v518_v32 = vrot.slane %v490_v26, %v1637_v25 }
  0xe7   : > { %858 = vrot.lane.b32.xlu0 %v826_v48, %s1440_s14  ;;  %876 = vrot.lane.b32.xlu1 %v835_v52, %s1440_s14  ;;  %v1697_v27 = vrot.slane %v521_v3, %v1641_v31  ;;  %v828_v30 = vmul.f32 %v807_v34, %v1693_v24  ;;  %v653_v37 = vmul.f32 %v632_v54, %v1693_v24  ;;  %v815_v51 = vpop.permute.xlu1 %814 }
  0xe8   : > { %v1706_v33 = vrot.slane %v455_v28, %v1641_v31  ;;  %v520_v38 = vcombine.high %v504_v49, %v504_v49  ;;  %v441_v39 = vcombine.high %v439_v20, %v439_v20  ;;  %v1714_v41 = vrot.slane %v518_v32, %v1641_v31 }
  0xe9   : > { %v837_v35 = vmul.f32 %v1667_v53, %v1697_v27  ;;  %v662_v43 = vmul.f32 %v1679_v61, %v1697_v27  ;;  %v472_v48 = vcombine.high %v462_v57, %v462_v57  ;;  %v471_v52 = vcombine.high %v455_v28, %v455_v28 }
  0xea   : > { %v830_v34 = vmul.f32 %v811_v60, %v1706_v33  ;;  %v469_v44 = vrot.slane %v441_v39, %v1637_v25  ;;  %v1723_v45 = vrot.slane %v520_v38, %v1641_v31  ;;  %v839_v47 = vmul.f32 %v813_v42, %v1714_v41  ;;  %v638_v25 = vpop.permute.xlu0 %637 }
  0xeb   : > { %683 = vrot.lane.b32.xlu0 %v651_v55, %s1440_s14  ;;  %878 = vrot.lane.b32.xlu1 %v836_v58, %s1440_s14  ;;  %v655_v49 = vmul.f32 %v636_v22, %v1706_v33  ;;  %v1735_v58 = vrot.slane %v472_v48, %v1641_v31  ;;  %v522_v57 = vcombine.high %v518_v32, %v518_v32 }
  0xec   : > { %v1730_v54 = vrot.slane %v469_v44, %v1641_v31  ;;  %v840_v55 = vmul.f32 %v815_v51, %v1723_v45  ;;  %v1740_v60 = vrot.slane %v471_v52, %v1641_v31  ;;  %v473_v1 = vcombine.high %v469_v44, %v469_v44 }
  0xed   : > { %v1749_v3 = vrot.slane %v522_v57, %v1641_v31  ;;  %v654_v20 = vmul.f32 %v1679_v61, %v1735_v58  ;;  %v1772_v61 = vld [vmem:[%s1945_s2] sm:$0xf]  ;;  %v787_v44 = vmul.f32 %v1655_v46, %v1578_v8  ;;  %v611_v52 = vmul.f32 %v1645_v36, %v1556_v4 }
  0xee   : > { %v831_v62 = vmul.f32 %v813_v42, %v1730_v54  ;;  %v1756_v22 = vrot.slane %v473_v1, %v1641_v31  ;;  %v656_v26 = vmul.f32 %v638_v25, %v1730_v54  ;;  %v640_v28 = vpop.permute.xlu0 %639  ;;  %v612_v1 = vmul.f32 %v1655_v46, %v1568_v6 }
  0xef   : > { %701 = vrot.lane.b32.xlu0 %v660_v59, %s1440_s14  ;;  %882 = vrot.lane.b32.xlu1 %v838_v0, %s1440_s14  ;;  %v664_v59 = vmul.f32 %v638_v25, %v1714_v41  ;;  %v829_v0 = vmul.f32 %v1667_v53, %v1735_v58  ;;  %v953_v53 = vld [vmem:[%s1946_s3] sm:$0xf]  ;;  %v788_v25 = vmul.f32 %v1663_v50, %v1588_v10 }
  0xf0   : > { %1290 = vmatprep.subr.msk.mxu1 %vm960_vm1, %v953_v53 }
  0xf1   : > { %1291 = vmatpush3.msk.msra.mxu1 %vm960_vm1, %v953_v53 }
  0xf2   : > { %1295 = vmatprep.subr.msk.mxu1 %vm960_vm1, %v1772_v61 }
  0xf3   : > { %703 = vrot.lane.b32.xlu0 %v661_v2, %s1440_s14  ;;  %860 = vrot.lane.b32.xlu1 %v827_v21, %s1440_s14  ;;  %v832_v2 = vmul.f32 %v815_v51, %v1740_v60  ;;  %v817_v21 = vpop.permute.xlu1 %816 }
  0xf4   : > { %v833_v31 = vmul.f32 %v817_v21, %v1756_v22 }
  0xf7   : > { %707 = vrot.lane.b32.xlu0 %v663_v23, %s1440_s14  ;;  %685 = vrot.lane.b32.xlu1 %v652_v29, %s1440_s14  ;;  %v841_v23 = vmul.f32 %v817_v21, %v1749_v3  ;;  %v657_v29 = vmul.f32 %v640_v28, %v1740_v60  ;;  %v642_v32 = vpop.permute.xlu1 %641 }
  0xfb   : > { %862 = vrot.lane.b32.xlu0 %v828_v30, %s1440_s14  ;;  %880 = vrot.lane.b32.xlu1 %v837_v35, %s1440_s14  ;;  %v665_v30 = vmul.f32 %v640_v28, %v1723_v45  ;;  %v658_v35 = vmul.f32 %v642_v32, %v1756_v22  ;;  %v613_v28 = vmul.f32 %v1663_v50, %v1562_v5 }
  0xff   : > { %687 = vrot.lane.b32.xlu0 %v653_v37, %s1440_s14  ;;  %866 = vrot.lane.b32.xlu1 %v830_v34, %s1440_s14  ;;  %v666_v37 = vmul.f32 %v642_v32, %v1749_v3  ;;  %v786_v34 = vmul.f32 %v1645_v36, %v1571_v7 }
 0x103   : > { %705 = vrot.lane.b32.xlu0 %v662_v43, %s1440_s14  ;;  %884 = vrot.lane.b32.xlu1 %v839_v47, %s1440_s14 }
 0x107   : > { %691 = vrot.lane.b32.xlu0 %v655_v49, %s1440_s14  ;;  %886 = vrot.lane.b32.xlu1 %v840_v55, %s1440_s14 }
 0x10b   : > { %709 = vrot.lane.b32.xlu0 %v664_v59, %s1440_s14  ;;  %868 = vrot.lane.b32.xlu1 %v831_v62, %s1440_s14 }
 0x10f   : > { %864 = vrot.lane.b32.xlu0 %v829_v0, %s1440_s14  ;;  %870 = vrot.lane.b32.xlu1 %v832_v2, %s1440_s14 }
 0x113   : > { %689 = vrot.lane.b32.xlu0 %v654_v20, %s1440_s14  ;;  %888 = vrot.lane.b32.xlu1 %v841_v23, %s1440_s14 }
 0x117   : > { %693 = vrot.lane.b32.xlu0 %v656_v26, %s1440_s14  ;;  %872 = vrot.lane.b32.xlu1 %v833_v31, %s1440_s14  ;;  %v778_v26 = vmul.f32 %v1650_v40, %v1571_v7 }
 0x11b   : > { %695 = vrot.lane.b32.xlu0 %v657_v29, %s1440_s14  ;;  %711 = vrot.lane.b32.xlu1 %v665_v30, %s1440_s14 }
 0x11f   : > { %697 = vrot.lane.b32.xlu0 %v658_v35, %s1440_s14  ;;  %713 = vrot.lane.b32.xlu1 %v666_v37, %s1440_s14  ;;  %v779_v35 = vmul.f32 %v1682_v63, %v1578_v8  ;;  %s1441_s14 = smov [#allocation2]  }
 0x120   : > { %s1364_s15 = sshll.u32 %s1441_s14, 4  ;;  %s1365_s15 = int_to_ptr.vmem [resolvable:$false] %s1364_s15 }
 0x121   : > { %s1366_s16 = scalar_lea.vmem %s1365_s15, 512  ;;  %p1367_p1 = scmp.lt.s32.totalorder %s1889_s28, %s1365_s15 }
 0x122   : > { %p1368_p2 = scmp.lt.s32.totalorder %s1366_s16, %s1360_s24 }
 0x124   : > { %p1369_p3 = por %p1368_p2, %p1367_p1 }
 0x126   : > { %p1370_p5 = pnand %p1369_p3, %p1363_p0 }
 0x155   : > { %v875_v38 = vpop.permute.xlu0 %874  ;;  %v700_v39 = vpop.permute.xlu1 %699 }
 0x156   : > { %v914_v43 = vadd.f32 %v875_v38, %v786_v34  ;;  %v739_v62 = vsub.f32 %v611_v52, %v700_v39  ;;  %v603_v38 = vmul.f32 %v1650_v40, %v1556_v4  ;;  %v780_v52 = vmul.f32 %v1693_v24, %v1588_v10 }
 0x157   : > { %v790_v4 = vmul.f32 %v1672_v56, %v1608_v14  ;;  %v605_v10 = vmul.f32 %v1693_v24, %v1562_v5 }
 0x158   : > { %v937_v51 = vsel %vm747_vm2, %v914_v43, 0.0  ;;  %v763_v36 = vsel %vm747_vm2, %v739_v62, 0.0 }
 0x159   : > { %v859_v42 = vpop.permute.xlu0 %858  ;;  %v877_v47 = vpop.permute.xlu1 %876 }
 0x15a   : > { %v915_v48 = vadd.f32 %v877_v47, %v787_v44  ;;  %v906_v32 = vadd.f32 %v859_v42, %v778_v26  ;;  %v604_v42 = vmul.f32 %v1682_v63, %v1568_v6 }
 0x15c   : > { %v938_v55 = vsel %vm747_vm2, %v915_v48, 0.0  ;;  %v922_v44 = vsel %vm747_vm2, %v906_v32, 0.0 }
 0x15d   : > { %v684_v49 = vpop.permute.xlu0 %683  ;;  %v939_v59 = vadd.f32 %v938_v55, %v937_v51  ;;  %v879_v57 = vpop.permute.xlu1 %878 }
 0x15e   : > { %v916_v0 = vadd.f32 %v879_v57, %v788_v25  ;;  %v731_v47 = vsub.f32 %v603_v38, %v684_v49 }
 0x160   : > { %v940_v20 = vsel %vm747_vm2, %v916_v0, 0.0  ;;  %v748_v55 = vsel %vm747_vm2, %v731_v47, 0.0 }
 0x161   : > { %v702_v2 = vpop.permute.xlu0 %701  ;;  %v941_v23 = vadd.f32 %v940_v20, %v939_v59  ;;  %v883_v53 = vpop.permute.xlu1 %882  ;;  %v789_v59 = vmul.f32 %v1697_v27, %v1598_v12 }
 0x162   : > { %v740_v21 = vsub.f32 %v612_v1, %v702_v2  ;;  %v918_v63 = vadd.f32 %v883_v53, %v790_v4 }
 0x164   : > { %v764_v31 = vsel %vm747_vm2, %v740_v21, 0.0 }
 0x165   : > { %v765_v29 = vadd.f32 %v764_v31, %v763_v36  ;;  %v704_v30 = vpop.permute.xlu0 %703  ;;  %v861_v37 = vpop.permute.xlu1 %860  ;;  %v944_v31 = vsel %vm747_vm2, %v918_v63, 0.0  ;;  %v607_v63 = vmul.f32 %v1706_v33, %v1591_v11 }
 0x166   : > { %v741_v46 = vsub.f32 %v613_v28, %v704_v30  ;;  %v907_v34 = vadd.f32 %v861_v37, %v779_v35  ;;  %v615_v28 = vmul.f32 %v1672_v56, %v1591_v11  ;;  %v791_v35 = vmul.f32 %v1714_v41, %v1618_v16 }
 0x168   : > { %v766_v39 = vsel %vm747_vm2, %v741_v46, 0.0  ;;  %v923_v50 = vsel %vm747_vm2, %v907_v34, 0.0 }
 0x169   : > { %v767_v7 = vadd.f32 %v766_v39, %v765_v29  ;;  %v708_v43 = vpop.permute.xlu0 %707  ;;  %v924_v48 = vadd.f32 %v923_v50, %v922_v44  ;;  %v686_v51 = vpop.permute.xlu1 %685  ;;  %v614_v29 = vmul.f32 %v1697_v27, %v1581_v9  ;;  %v792_v27 = vmul.f32 %v1723_v45, %v1628_v18 }
 0x16a   : > { %v732_v8 = vsub.f32 %v604_v42, %v686_v51  ;;  %v743_v24 = vsub.f32 %v615_v28, %v708_v43 }
 0x16c   : > { %v749_v25 = vsel %vm747_vm2, %v732_v8, 0.0  ;;  %v770_v56 = vsel %vm747_vm2, %v743_v24, 0.0 }
 0x16d   : > { %v863_v40 = vpop.permute.xlu0 %862  ;;  %v750_v57 = vadd.f32 %v749_v25, %v748_v55  ;;  %v881_v6 = vpop.permute.xlu1 %880  ;;  %v781_v25 = vmul.f32 %v1735_v58, %v1598_v12  ;;  %v606_v12 = vmul.f32 %v1735_v58, %v1581_v9  ;;  %v608_v9 = vmul.f32 %v1730_v54, %v1601_v13 }
 0x16e   : > { %v908_v49 = vadd.f32 %v863_v40, %v780_v52  ;;  %v917_v0 = vadd.f32 %v881_v6, %v789_v59  ;;  %v782_v40 = vmul.f32 %v1706_v33, %v1608_v14  ;;  %v784_v14 = vmul.f32 %v1740_v60, %v1628_v18 }
 0x170   : > { %v925_v62 = vsel %vm747_vm2, %v908_v49, 0.0  ;;  %v942_v20 = vsel %vm747_vm2, %v917_v0, 0.0 }
 0x171   : > { %v926_v1 = vadd.f32 %v925_v62, %v924_v48  ;;  %v688_v2 = vpop.permute.xlu0 %687  ;;  %v943_v36 = vadd.f32 %v942_v20, %v941_v23  ;;  %v867_v26 = vpop.permute.xlu1 %866  ;;  %v616_v48 = vmul.f32 %v1714_v41, %v1601_v13  ;;  %v783_v41 = vmul.f32 %v1730_v54, %v1618_v16 }
 0x172   : > { %v733_v21 = vsub.f32 %v605_v10, %v688_v2  ;;  %v609_v54 = vmul.f32 %v1740_v60, %v1611_v15 }
 0x173   : > { %v945_v5 = vadd.f32 %v944_v31, %v943_v36 }
 0x174   : > { %v751_v53 = vsel %vm747_vm2, %v733_v21, 0.0  ;;  %v793_v21 = vmul.f32 %v1749_v3, %v1631_v19 }
 0x175   : > { %v752_v30 = vadd.f32 %v751_v53, %v750_v57  ;;  %v706_v32 = vpop.permute.xlu0 %705  ;;  %v885_v23 = vpop.permute.xlu1 %884  ;;  %v910_v57 = vadd.f32 %v867_v26, %v782_v40 }
 0x176   : > { %v742_v46 = vsub.f32 %v614_v29, %v706_v32  ;;  %v919_v38 = vadd.f32 %v885_v23, %v791_v35  ;;  %v785_v29 = vmul.f32 %v1756_v22, %v1631_v19 }
 0x177   : > { %v929_v16 = vsel %vm747_vm2, %v910_v57, 0.0 }
 0x178   : > { %v768_v37 = vsel %vm747_vm2, %v742_v46, 0.0  ;;  %v946_v44 = vsel %vm747_vm2, %v919_v38, 0.0 }
 0x179   : > { %v769_v39 = vadd.f32 %v768_v37, %v767_v7  ;;  %v692_v34 = vpop.permute.xlu0 %691  ;;  %v947_v47 = vadd.f32 %v946_v44, %v945_v5  ;;  %v887_v50 = vpop.permute.xlu1 %886  ;;  %v617_v44 = vmul.f32 %v1723_v45, %v1611_v15  ;;  %v618_v15 = vmul.f32 %v1749_v3, %v1621_v17 }
 0x17a   : > { %v920_v42 = vadd.f32 %v887_v50, %v792_v27  ;;  %v735_v36 = vsub.f32 %v607_v63, %v692_v34 }
 0x17b   : > { %v771_v43 = vadd.f32 %v770_v56, %v769_v39 }
 0x17c   : > { %v948_v8 = vsel %vm747_vm2, %v920_v42, 0.0  ;;  %v755_v5 = vsel %vm747_vm2, %v735_v36, 0.0 }
 0x17d   : > { %v710_v51 = vpop.permute.xlu0 %709  ;;  %v949_v7 = vadd.f32 %v948_v8, %v947_v47  ;;  %v869_v4 = vpop.permute.xlu1 %868 }
 0x17e   : > { %v744_v52 = vsub.f32 %v616_v48, %v710_v51  ;;  %v911_v0 = vadd.f32 %v869_v4, %v783_v41  ;;  %v610_v48 = vmul.f32 %v1756_v22, %v1621_v17 }
 0x180   : > { %v772_v55 = vsel %vm747_vm2, %v744_v52, 0.0  ;;  %v931_v28 = vsel %vm747_vm2, %v911_v0, 0.0 }
 0x181   : > { %v773_v49 = vadd.f32 %v772_v55, %v771_v43  ;;  %v865_v59 = vpop.permute.xlu0 %864  ;;  %v871_v62 = vpop.permute.xlu1 %870 }
 0x182   : > { %v909_v6 = vadd.f32 %v865_v59, %v781_v25  ;;  %v912_v26 = vadd.f32 %v871_v62, %v784_v14 }
 0x184   : > { %v927_v10 = vsel %vm747_vm2, %v909_v6, 0.0  ;;  %v933_v24 = vsel %vm747_vm2, %v912_v26, 0.0 }
 0x185   : > { %v928_v2 = vadd.f32 %v927_v10, %v926_v1  ;;  %v690_v20 = vpop.permute.xlu0 %689  ;;  %v889_v31 = vpop.permute.xlu1 %888 }
 0x186   : > { %v734_v11 = vsub.f32 %v606_v12, %v690_v20  ;;  %v921_v18 = vadd.f32 %v889_v31, %v793_v21 }
 0x187   : > { %v930_v33 = vadd.f32 %v929_v16, %v928_v2 }
 0x188   : > { %v753_v53 = vsel %vm747_vm2, %v734_v11, 0.0  ;;  %v950_v46 = vsel %vm747_vm2, %v921_v18, 0.0 }
 0x189   : > { %v754_v58 = vadd.f32 %v753_v53, %v752_v30  ;;  %v694_v1 = vpop.permute.xlu0 %693  ;;  %v932_v32 = vadd.f32 %v931_v28, %v930_v33  ;;  %v951_v23 = vadd.f32 %v950_v46, %v949_v7  ;;  %v873_v38 = vpop.permute.xlu1 %872 }
 0x18a   : > { %v736_v35 = vsub.f32 %v608_v9, %v694_v1  ;;  %v913_v13 = vadd.f32 %v873_v38, %v785_v29 }
 0x18b   : > { %v756_v37 = vadd.f32 %v755_v5, %v754_v58  ;;  %v934_v39 = vadd.f32 %v933_v24, %v932_v32 }
 0x18c   : > { %v757_v34 = vsel %vm747_vm2, %v736_v35, 0.0  ;;  %v935_v27 = vsel %vm747_vm2, %v913_v13, 0.0 }
 0x18d   : > { %v758_v30 = vadd.f32 %v757_v34, %v756_v37  ;;  %v696_v19 = vpop.permute.xlu0 %695  ;;  %v712_v47 = vpop.permute.xlu1 %711  ;;  %v936_v50 = vadd.f32 %v935_v27, %v934_v39 }
 0x18e   : > { %v737_v56 = vsub.f32 %v609_v54, %v696_v19  ;;  %v745_v42 = vsub.f32 %v617_v44, %v712_v47 }
 0x18f   : > { %1292 = vmatprep.mubr.msk.f32.mxu1 %vm747_vm2, %v936_v50 }
 0x190   : > { %v759_v43 = vsel %vm747_vm2, %v737_v56, 0.0  ;;  %v774_v8 = vsel %vm747_vm2, %v745_v42, 0.0  ;;  %1293 = vmatmul.mubr.msk.f32.vlgmr.msra.gmra.mxu1 %vm747_vm2, %v951_v23 }
 0x191   : > { %v760_v51 = vadd.f32 %v759_v43, %v758_v30  ;;  %v698_v60 = vpop.permute.xlu0 %697  ;;  %v775_v52 = vadd.f32 %v774_v8, %v773_v49  ;;  %v714_v7 = vpop.permute.xlu1 %713  ;;  %1296 = vmatpush3.msk.msra.mxu1 %vm960_vm1, %v1772_v61 }
 0x192   : > { %v738_v45 = vsub.f32 %v610_v48, %v698_v60  ;;  %v746_v22 = vsub.f32 %v618_v15, %v714_v7 }
 0x194   : > { %v761_v4 = vsel %vm747_vm2, %v738_v45, 0.0  ;;  %v776_v55 = vsel %vm747_vm2, %v746_v22, 0.0 }
 0x195   : > { %v762_v40 = vadd.f32 %v761_v4, %v760_v51  ;;  %v777_v25 = vadd.f32 %v776_v55, %v775_v52 }
 0x197   : > { %1297 = vmatprep.mubr.msk.f32.mxu1 %vm747_vm2, %v762_v40 }
 0x198   : > { %1298 = vmatmul.mubr.msk.f32.vlgmr.msra.gmra.mxu1 %vm747_vm2, %v777_v25 }
 0x250   : > { %v1294_v17 = vpop.f32.mrf.mxu1 }
 0x252   : > { %v1030_v3 = vpop.f32.mrf.mxu1 }
 0x258   : > { %v1299_v49 = vpop.f32.mrf.mxu1 }
 0x259   : > { %v1120_v61 = vadd.f32 %v1299_v49, %v1294_v17 }
 0x25a   : > { %v1114_v59 = vpop.f32.mrf.mxu1 }
 0x25b   : > { %1124 = vst.msk [vmem:[%s299_s27 + $0x8] sm:$0xff] %vm325_vm0, %v1120_v61  ;;  %v1115_v57 = vadd.f32 %v1114_v59, %v1030_v3 }
 0x25d   : > { %1123 = vst.msk [vmem:[%s299_s27] sm:$0xff] %vm325_vm0, %v1115_v57 }
 0x25e   : > { %1373 = shalt.err (!%p1370_p5)
}
 0x25f   : > { %s1374_s17 = scalar_lea.hbm %s1895_s12, 256  ;;  %s1378_s20 = scalar_lea.hbm %s1949_s6, 2048 }
 0x260   : > { %p1375_p6 = scmp.ne.s32.totalorder %s1895_s12, %s1374_s17  ;;  %p1379_p10 = scmp.lt.s32.totalorder %s1895_s12, %s1949_s6 }
 0x261   : > { %p1380_p11 = scmp.lt.s32.totalorder %s1378_s20, %s1374_s17 }
 0x262   : > { %p1376_p7 = pnand %p1375_p6, %p1519_p4 }
 0x263   : > { %p1381_p12 = por %p1380_p11, %p1379_p10 }
 0x264   : > { %p1377_p9 = pneg %p1376_p7 }
 0x266   : > { %p1382_p13 = pnand %p1381_p12, %p1377_p9 }
 0x268   : > { %1385 = shalt.err (!%p1382_p13)
}
 0x269   : > { %s1442_s8 = smov 128   ;;  %s1443_s11 = smov 8  }
 0x26a   : > { %1300 = dma.vmem_to_hbm [thread:$0]  (%p1519_p4), %s1889_s28, 256, %s1895_s12, %s1898_s13, %s1442_s8, %s1442_s8, %s1443_s11  }
 0x26b PF: > { %p1306_p0 = scmp.ge.s32.totalorder %s1436_s26, 2  ;;  %s1156_s24 = sand.u32 1, %s1416_s21  }
 0x26c   : > { %s1157_s14 = scalar_lea.sflag [#allocation3], %s1156_s24 }
 0x26d   : > { %p1303_p1 = pnand %p1306_p0, %p1526_p8 }
 0x26f   : > { %p1304_p2 = pneg %p1303_p1 }
 0x271   : > { %1411 = dma.done.wait (%p1304_p2), %s1157_s14, 256  }
 0x272   : > { %1413 = vsyncadd (%p1304_p2), %s1157_s14, 4294967040  ;;  %s19_s26 = sadd.s32 1, %s1436_s26   ;;  %s1952_s21 = smov %s1420_s22 }
 0x273   : > { %p16_p3 = scmp.ge.s32.totalorder %s19_s26, 10   ;;  %s1953_s22 = smov %s1424_s23 }
 0x274   : > { %s1954_s23 = smov %s1532_s10  ;;  %s1955_s24 = smov %s1432_s25 }
 0x275   : > { %s1956_s25 = smov %s1958_s29  ;;  %18 = sbr.rel (!%p16_p3) target bundleno = 4 (0x4), region = 85 }
 0x27a   :  { %1162 = vsyncpa [#allocation3], 1 }
 0x27b   :  { %1164 = vsyncpa [#allocation3 + $0x1], 1 }

</bundles_post_ra>
